<compile_context>
chip_gen: v7x
topology: tpu7x:2x2x1
jax: 0.10.0
libtpu: 0.0.40
codegen_flags: <defaults>
</compile_context>

<pallas_src>
import math

import jax
import jax.numpy as jnp
from jax import lax
from jax.experimental import pallas as pl
from jax.experimental.pallas import tpu as pltpu
import numpy as np


# ---------------- model config (tinybloom args, shrunk to small test shapes) ----------------
NUM_LAYERS = 2
LAYER_NUMBER = 1
NUM_HEADS = 1          # args.num_attention_heads
HEAD_DIM = 32          # args.kv_channels        (shrunk from 128)
HIDDEN = 32            # args.hidden_size        (shrunk from 128)
PROJ = NUM_HEADS * HEAD_DIM
SEQ = 8                # query_length == key_length (shrunk from 512)
BATCH = 2              # micro batch (shrunk from 16)
INIT_STD = 0.0048

NORM_FACTOR = math.sqrt(HEAD_DIM) * LAYER_NUMBER
BETA = 1.0 / LAYER_NUMBER            # alibi scaling
ALPHA = 1.0 / NORM_FACTOR            # QK^T scaling
SOFTMAX_SCALE = float(LAYER_NUMBER)  # ScaleMaskSoftmax(scale=layer_number)
MASK_VALUE = -10000.0

# Algebraic folding of the three scale constants:
#   SOFTMAX_SCALE * BETA  == 1.0         -> alibi added unscaled
#   SOFTMAX_SCALE * ALPHA == 1/sqrt(D)   -> folded into the Q slice of the QKV weight/bias
Q_SCALE = SOFTMAX_SCALE * ALPHA
assert abs(SOFTMAX_SCALE * BETA - 1.0) < 1e-12

# MXU operand dtype (accumulation is always fp32; softmax math stays fp32).
MATMUL_DTYPE = jnp.bfloat16


def _attention_kernel(x_ref, alibi_ref, wqkv_ref, bqkv_ref,
                      wdense_ref, bdense_ref, out_ref):
    """Fused Bloom attention, single invocation (no grid).

    x_ref      : (B*S, H)    fp32   hidden states, batch folded into M
    alibi_ref  : (B, 1, S)   fp32   (heads squeezed in the wrapper; NUM_HEADS == 1)
    wqkv_ref   : (H, 3P)     bf16   pre-transposed QKV weight, Q rows pre-scaled by 1/sqrt(D)
    bqkv_ref   : (1, 3P)     fp32   QKV bias, Q slice pre-scaled by 1/sqrt(D)
    wdense_ref : (P, H)      bf16   pre-transposed dense weight
    bdense_ref : (1, H)      fp32
    out_ref    : (B*S, H)    fp32
    """
    x = x_ref[...].astype(MATMUL_DTYPE)

    # --- QKV projection over the full (B*S, H) slab: one MXU matmul, M = B*S ---
    mixed = jnp.dot(x, wqkv_ref[...], preferred_element_type=jnp.float32)
    mixed = mixed + bqkv_ref[...]                              # (B*S, 3P) fp32

    # Split Q/K/V.  NUM_HEADS == 1 so PROJ == HEAD_DIM and the head layout is trivial:
    # the (B*S, P) -> (B, S, D) reshape only splits the sublane axis (aligned, cheap).
    # The 1/sqrt(D) scale is already baked into the Q projection weights, so no extra mul here.
    # TODO(synk): for NUM_HEADS > 1, fold heads into the einsum batch dim instead of a
    #             per-head loop + concatenate (keeps matmuls lane-dense, no XLU relayout).
    q = mixed[:, 0 * PROJ:1 * PROJ].reshape(BATCH, SEQ, HEAD_DIM)
    k = mixed[:, 1 * PROJ:2 * PROJ].reshape(BATCH, SEQ, HEAD_DIM)
    v = mixed[:, 2 * PROJ:3 * PROJ].reshape(BATCH, SEQ, HEAD_DIM)

    # --- scores (fp32):  alibi + (q / sqrt(D)) @ k^T   (all scale constants folded) ---
    scores = jnp.einsum('bqd,bkd->bqk',
                        q.astype(MATMUL_DTYPE), k.astype(MATMUL_DTYPE),
                        preferred_element_type=jnp.float32)    # (B, S, S)

    # causal mask, computed once for the whole tile; alibi add fused into the select.
    row = lax.broadcasted_iota(jnp.int32, (SEQ, SEQ), 0)
    col = lax.broadcasted_iota(jnp.int32, (SEQ, SEQ), 1)
    causal = (col <= row)[None]                                # (1, S, S)
    scores = jnp.where(causal, scores + alibi_ref[...], MASK_VALUE)

    # --- softmax in fp32 (ScaleMaskSoftmax: softmax_in_fp32=True) ---
    m = jnp.max(scores, axis=-1, keepdims=True)
    e = jnp.exp(scores - m)
    probs = e * pl.reciprocal(jnp.sum(e, axis=-1, keepdims=True), approx=True)

    # attention_dropout has p=0.0 (dropout disabled) -> identity
    ctx = jnp.einsum('bqk,bkd->bqd',
                     probs.astype(MATMUL_DTYPE), v.astype(MATMUL_DTYPE),
                     preferred_element_type=jnp.float32)       # (B, S, D)
    ctx = ctx.reshape(BATCH * SEQ, PROJ)                       # merge leading dims (aligned)

    # --- dense output projection over the full (B*S, P) slab ---
    out = jnp.dot(ctx.astype(MATMUL_DTYPE), wdense_ref[...],
                  preferred_element_type=jnp.float32)
    out_ref[...] = (out + bdense_ref[...]).astype(out_ref.dtype)


def attention_forward(hidden_states, alibi, w_qkv, b_qkv, w_dense, b_dense):
    B, S, H = hidden_states.shape
    assert NUM_HEADS == 1  # head squeeze below relies on single-head config

    # Wrapper-side layout/dtype plumbing (one-time parameter transforms, outside the kernel):
    #  - batch folded into the matmul M dimension
    #  - weights pre-transposed so the kernel does x @ W (no in-kernel .T)
    #  - the combined softmax_scale*alpha == 1/sqrt(D) factor folded into the Q rows of the
    #    QKV weight + bias (removes the only per-token scale multiply from the kernel)
    #  - weights cast to bf16 (MXU operand dtype); biases stay fp32
    qkv_scale = jnp.concatenate([jnp.full((PROJ,), Q_SCALE, jnp.float32),
                                 jnp.ones((2 * PROJ,), jnp.float32)])
    w_qkv_t = (w_qkv * qkv_scale[:, None]).T.astype(MATMUL_DTYPE)   # (H, 3P)
    b_qkv2 = (b_qkv * qkv_scale).reshape(1, -1)                     # (1, 3P)
    w_dense_t = w_dense.T.astype(MATMUL_DTYPE)                      # (P, H)
    b_dense2 = b_dense.reshape(1, -1)                               # (1, H)

    x2d = hidden_states.reshape(B * S, H)
    alibi_sq = alibi.reshape(B, 1, S)          # squeeze heads + query-singleton

    # Everything fits comfortably in VMEM at these shapes, so a single invocation
    # (no grid) avoids per-grid-step overhead entirely.
    # TODO(synk): at real Bloom shapes (B=16, S=512, H=128) grid over batch with
    #             dimension_semantics=("parallel",) (multiple of 2 for v7x dual-TC) and
    #             tile the projection reduction axis / set vmem_limit_bytes for v7x's 64 MiB.
    vmem = pltpu.MemorySpace.VMEM
    out2d = pl.pallas_call(
        _attention_kernel,
        out_shape=jax.ShapeDtypeStruct((B * S, H), jnp.float32),
        in_specs=[
            pl.BlockSpec(memory_space=vmem),   # hidden   (B*S, H)
            pl.BlockSpec(memory_space=vmem),   # alibi    (B, 1, S)
            pl.BlockSpec(memory_space=vmem),   # w_qkv^T  (H, 3P)
            pl.BlockSpec(memory_space=vmem),   # b_qkv    (1, 3P)
            pl.BlockSpec(memory_space=vmem),   # w_dense^T (P, H)
            pl.BlockSpec(memory_space=vmem),   # b_dense  (1, H)
        ],
        out_specs=pl.BlockSpec(memory_space=vmem),
    )(x2d, alibi_sq, w_qkv_t, b_qkv2, w_dense_t, b_dense2)

    return out2d.reshape(B, S, H)


def attention_reference(hidden_states, alibi, w_qkv, b_qkv, w_dense, b_dense):
    """Pure-JAX fp32 reference mirroring the torch forward (non-transposed branch)."""
    B, S, H = hidden_states.shape
    mixed = jnp.einsum('bsh,ph->bsp', hidden_states, w_qkv) + b_qkv
    q, k, v = jnp.split(mixed, 3, axis=-1)

    def to_heads(t):
        return t.reshape(B, S, NUM_HEADS, HEAD_DIM).transpose(0, 2, 1, 3)

    q, k, v = to_heads(q), to_heads(k), to_heads(v)
    scores = BETA * alibi[:, :, :, :S] + ALPHA * jnp.einsum('bhqd,bhkd->bhqk', q, k)
    scores = scores * SOFTMAX_SCALE
    causal = jnp.tril(jnp.ones((S, S), dtype=bool))[None, None]
    scores = jnp.where(causal, scores, MASK_VALUE)
    probs = jax.nn.softmax(scores, axis=-1)
    ctx = jnp.einsum('bhqk,bhkd->bhqd', probs, v)
    ctx = ctx.transpose(0, 2, 1, 3).reshape(B, S, PROJ)
    return jnp.einsum('bsp,hp->bsh', ctx, w_dense) + b_dense


if __name__ == "__main__":
    key = jax.random.PRNGKey(0)
    k_h, k_a, k_wq, k_wd = jax.random.split(key, 4)

    hidden_states = jax.random.normal(k_h, (BATCH, SEQ, HIDDEN), dtype=jnp.float32)
    alibi = jax.random.normal(k_a, (BATCH, NUM_HEADS, 1, SEQ), dtype=jnp.float32)

    # deterministic parameter init (matches ZeroBiasLinear: normal weights, zero bias)
    w_qkv = INIT_STD * jax.random.normal(k_wq, (3 * PROJ, HIDDEN), dtype=jnp.float32)
    b_qkv = jnp.zeros((3 * PROJ,), dtype=jnp.float32)
    w_dense = (INIT_STD / math.sqrt(2.0 * NUM_LAYERS)) * jax.random.normal(
        k_wd, (HIDDEN, PROJ), dtype=jnp.float32)
    b_dense = jnp.zeros((HIDDEN,), dtype=jnp.float32)

    out = attention_forward(hidden_states, alibi, w_qkv, b_qkv, w_dense, b_dense)
    out = jax.block_until_ready(out)

    ref = attention_reference(hidden_states, alibi, w_qkv, b_qkv, w_dense, b_dense)
    # Tolerance widened for bf16 MXU operands + approx reciprocal (softmax itself is fp32).
    np.testing.assert_allclose(np.asarray(out), np.asarray(ref), rtol=2e-2, atol=2e-4)

    print("KERNEL_OK")
</pallas_src>

<mosaic_0001>
module attributes {stable_mosaic.version = 11 : i64} {
  func.func @_attention_kernel(%arg0: memref<16x32xf32, #tpu.memory_space<vmem>>, %arg1: memref<2x1x8xf32, #tpu.memory_space<vmem>>, %arg2: memref<32x96xbf16, #tpu.memory_space<vmem>>, %arg3: memref<1x96xf32, #tpu.memory_space<vmem>>, %arg4: memref<32x32xbf16, #tpu.memory_space<vmem>>, %arg5: memref<1x32xf32, #tpu.memory_space<vmem>>, %arg6: memref<16x32xf32, #tpu.memory_space<vmem>>) attributes {dimension_semantics = [], scalar_prefetch = 0 : i64, scratch_operands = 0 : i64, tpu.core_type = #tpu.core_type<tc>} {
    %c0 = arith.constant 0 : index
    %c0_0 = arith.constant 0 : index
    %0 = vector.load %arg0[%c0, %c0_0] : memref<16x32xf32, #tpu.memory_space<vmem>>, vector<16x32xf32>
    %1 = arith.truncf %0 : vector<16x32xf32> to vector<16x32xbf16>
    %c0_1 = arith.constant 0 : index
    %c0_2 = arith.constant 0 : index
    %2 = vector.load %arg2[%c0_1, %c0_2] : memref<32x96xbf16, #tpu.memory_space<vmem>>, vector<32x96xbf16>
    %cst = arith.constant dense<0.000000e+00> : vector<16x96xf32>
    %3 = tpu.matmul %1, %2, %cst {dimension_numbers = #tpu.dot_dimension_numbers<[1], [0], [0], [1], [0, 0, 1, 1], [], []>} : vector<16x32xbf16>, vector<32x96xbf16>, vector<16x96xf32> -> vector<16x96xf32>
    %c0_3 = arith.constant 0 : index
    %c0_4 = arith.constant 0 : index
    %4 = vector.load %arg3[%c0_3, %c0_4] : memref<1x96xf32, #tpu.memory_space<vmem>>, vector<1x96xf32>
    %5 = vector.broadcast %4 : vector<1x96xf32> to vector<16x96xf32>
    %6 = arith.addf %3, %5 : vector<16x96xf32>
    %7 = vector.extract_strided_slice %6 {offsets = [0, 0], sizes = [16, 32], strides = [1, 1]} : vector<16x96xf32> to vector<16x32xf32>
    %8 = vector.shape_cast %7 : vector<16x32xf32> to vector<2x8x32xf32>
    %9 = vector.extract_strided_slice %6 {offsets = [0, 32], sizes = [16, 32], strides = [1, 1]} : vector<16x96xf32> to vector<16x32xf32>
    %10 = vector.shape_cast %9 : vector<16x32xf32> to vector<2x8x32xf32>
    %11 = vector.extract_strided_slice %6 {offsets = [0, 64], sizes = [16, 32], strides = [1, 1]} : vector<16x96xf32> to vector<16x32xf32>
    %12 = vector.shape_cast %11 : vector<16x32xf32> to vector<2x8x32xf32>
    %13 = arith.truncf %8 : vector<2x8x32xf32> to vector<2x8x32xbf16>
    %14 = arith.truncf %10 : vector<2x8x32xf32> to vector<2x8x32xbf16>
    "tpu.trace_start"() <{level = 10 : i32, message = "bqd,bkd->bqk"}> : () -> ()
    %cst_5 = arith.constant dense<0.000000e+00> : vector<2x8x8xf32>
    %15 = tpu.matmul %13, %14, %cst_5 {dimension_numbers = #tpu.dot_dimension_numbers<[2], [2], [1], [1], [0, 0, 0, 1, 1, 1], [0], [0]>} : vector<2x8x32xbf16>, vector<2x8x32xbf16>, vector<2x8x8xf32> -> vector<2x8x8xf32>
    "tpu.trace_stop"() : () -> ()
    %16 = tpu.iota {dimensions = array<i32: 0>} : vector<8x8xi32>
    %17 = tpu.iota {dimensions = array<i32: 1>} : vector<8x8xi32>
    %18 = arith.cmpi sle, %17, %16 : vector<8x8xi32>
    %19 = vector.shape_cast %18 : vector<8x8xi1> to vector<1x8x8xi1>
    %c0_6 = arith.constant 0 : index
    %c0_7 = arith.constant 0 : index
    %c0_8 = arith.constant 0 : index
    %20 = vector.load %arg1[%c0_6, %c0_7, %c0_8] : memref<2x1x8xf32, #tpu.memory_space<vmem>>, vector<2x1x8xf32>
    %21 = vector.broadcast %20 : vector<2x1x8xf32> to vector<2x8x8xf32>
    %22 = arith.addf %15, %21 : vector<2x8x8xf32>
    %cst_9 = arith.constant -1.000000e+04 : f32
    %23 = vector.shape_cast %19 : vector<1x8x8xi1> to vector<1x8x8xi1>
    %24 = vector.broadcast %23 : vector<1x8x8xi1> to vector<2x8x8xi1>
    %25 = vector.broadcast %cst_9 : f32 to vector<2x8x8xf32>
    %26 = arith.select %24, %22, %25 : vector<2x8x8xi1>, vector<2x8x8xf32>
    %cst_10 = arith.constant dense<0xFF800000> : vector<2x8xf32>
    %27 = vector.multi_reduction <maximumf>, %26, %cst_10 [2] : vector<2x8x8xf32> to vector<2x8xf32>
    %28 = vector.shape_cast %27 : vector<2x8xf32> to vector<2x8x1xf32>
    %29 = vector.broadcast %28 : vector<2x8x1xf32> to vector<2x8x8xf32>
    %30 = arith.subf %26, %29 : vector<2x8x8xf32>
    %31 = math.exp %30 : vector<2x8x8xf32>
    %cst_11 = arith.constant dense<0.000000e+00> : vector<2x8xf32>
    %32 = vector.multi_reduction <add>, %31, %cst_11 [2] : vector<2x8x8xf32> to vector<2x8xf32>
    %33 = vector.shape_cast %32 : vector<2x8xf32> to vector<2x8x1xf32>
    %34 = tpu.reciprocal %33 {approx = true} : vector<2x8x1xf32> -> vector<2x8x1xf32>
    %35 = vector.broadcast %34 : vector<2x8x1xf32> to vector<2x8x8xf32>
    %36 = arith.mulf %31, %35 : vector<2x8x8xf32>
    %37 = arith.truncf %36 : vector<2x8x8xf32> to vector<2x8x8xbf16>
    %38 = arith.truncf %12 : vector<2x8x32xf32> to vector<2x8x32xbf16>
    "tpu.trace_start"() <{level = 10 : i32, message = "bqk,bkd->bqd"}> : () -> ()
    %cst_12 = arith.constant dense<0.000000e+00> : vector<2x8x32xf32>
    %39 = tpu.matmul %37, %38, %cst_12 {dimension_numbers = #tpu.dot_dimension_numbers<[2], [1], [1], [2], [0, 0, 0, 1, 1, 2], [0], [0]>} : vector<2x8x8xbf16>, vector<2x8x32xbf16>, vector<2x8x32xf32> -> vector<2x8x32xf32>
    "tpu.trace_stop"() : () -> ()
    %40 = vector.shape_cast %39 : vector<2x8x32xf32> to vector<16x32xf32>
    %41 = arith.truncf %40 : vector<16x32xf32> to vector<16x32xbf16>
    %c0_13 = arith.constant 0 : index
    %c0_14 = arith.constant 0 : index
    %42 = vector.load %arg4[%c0_13, %c0_14] : memref<32x32xbf16, #tpu.memory_space<vmem>>, vector<32x32xbf16>
    %cst_15 = arith.constant dense<0.000000e+00> : vector<16x32xf32>
    %43 = tpu.matmul %41, %42, %cst_15 {dimension_numbers = #tpu.dot_dimension_numbers<[1], [0], [0], [1], [0, 0, 1, 1], [], []>} : vector<16x32xbf16>, vector<32x32xbf16>, vector<16x32xf32> -> vector<16x32xf32>
    %c0_16 = arith.constant 0 : index
    %c0_17 = arith.constant 0 : index
    %44 = vector.load %arg5[%c0_16, %c0_17] : memref<1x32xf32, #tpu.memory_space<vmem>>, vector<1x32xf32>
    %45 = vector.broadcast %44 : vector<1x32xf32> to vector<16x32xf32>
    %46 = arith.addf %43, %45 : vector<16x32xf32>
    %c0_18 = arith.constant 0 : index
    %c0_19 = arith.constant 0 : index
    %47 = vector.load %arg6[%c0_18, %c0_19] : memref<16x32xf32, #tpu.memory_space<vmem>>, vector<16x32xf32>
    tpu.vector_store %arg6[%c0_18, %c0_19], %46 {strides = array<i32>} : memref<16x32xf32, #tpu.memory_space<vmem>>, vector<16x32xf32>,
    return
  }
}

</mosaic_0001>

<bundles_post_ra>
// kernel: tpu_custom_call.1
= control target key start
LH: loop header
LB: loop body
LE: loop exit
PB: predicated region body
PF: predicated region fallthrough
CT: control target
= control target key end

     0   :  { %11 = vsyncpa [#allocation3], 0  ;;  %s811_s0 = inlined_call_operand.hbm [shape: f32[16,32], index: 0, kind: input, shape index: {}]   ;;  %s812_s1 = inlined_call_operand.vmem [shape: f32[2,1,8], index: 1, kind: input, shape index: {}]   ;;  %s813_s2 = inlined_call_operand.hbm [shape: bf16[32,96], index: 2, kind: input, shape index: {}]   ;;  %s814_s3 = inlined_call_operand.vmem [shape: f32[1,96], index: 3, kind: input, shape index: {}]   ;;  %s815_s4 = inlined_call_operand.hbm [shape: bf16[32,32], index: 4, kind: input, shape index: {}]   ;;  %s816_s5 = inlined_call_operand.vmem [shape: f32[1,32], index: 5, kind: input, shape index: {}]   ;;  %s817_s6 = inlined_call_operand.hbm [shape: f32[16,32], index: 6, kind: output, shape index: {}]  }
   0x1   :  { %12 = vsyncpa [#allocation6], 0 }
   0x2   :  { %13 = vsyncpa [#allocation4], 0  ;;  %s655_s21 = smov [#allocation5]   ;;  %s561_s25 = scalar_lea.hbm %s813_s2, 256 }
   0x3   :  { %s33_s22 = sshll.u32 %s655_s21, 4  ;;  %p562_p0 = scmp.ne.s32.totalorder %s813_s2, %s561_s25  ;;  %s34_s22 = int_to_ptr.vmem [resolvable:$true] %s33_s22 }
   0x4   :  { %p565_p1 = scmp.lt.u32.totalorder %s561_s25, %s813_s2 }
   0x6   :  { %p567_p2 = pnand %p565_p1, %p562_p0 }
   0x8   :  { %570 = shalt.err (!%p567_p2)
}
   0x9   :  { %s571_s30 = scalar_lea.vmem %s34_s22, 256  ;;  %p576_p4 = scmp.lt.s32.totalorder %s34_s22, %s34_s22 }
   0xa   :  { %p572_p3 = scmp.ne.s32.totalorder %s34_s22, %s571_s30  ;;  %p577_p5 = scmp.lt.s32.totalorder %s571_s30, %s571_s30 }
   0xc   :  { %p578_p6 = por %p577_p5, %p576_p4 }
   0xe   :  { %p579_p7 = pnand %p578_p6, %p572_p3 }
  0x10   :  { %582 = shalt.err (!%p579_p7)
}
  0x11   :  { %s656_s7 = smov 64   ;;  %s657_s8 = smov 4  }
  0x12   :  { %39 = dma.hbm_to_vmem [thread:$0]  %s813_s2, 256, %s34_s22, [#allocation6], %s656_s7, %s656_s7, %s657_s8  }
  0x13   :  { %s658_s11 = smov [#allocation2]   ;;  %s583_s15 = scalar_lea.hbm %s811_s0, 256 }
  0x14   :  { %s19_s12 = sshll.u32 %s658_s11, 4  ;;  %p584_p8 = scmp.ne.s32.totalorder %s811_s0, %s583_s15  ;;  %s20_s12 = int_to_ptr.vmem [resolvable:$true] %s19_s12 }
  0x15   :  { %p587_p9 = scmp.lt.u32.totalorder %s583_s15, %s811_s0 }
  0x17   :  { %p589_p10 = pnand %p587_p9, %p584_p8 }
  0x19   :  { %592 = shalt.err (!%p589_p10)
}
  0x1a   :  { %s593_s20 = scalar_lea.vmem %s20_s12, 256  ;;  %p598_p12 = scmp.lt.s32.totalorder %s20_s12, %s20_s12 }
  0x1b   :  { %p594_p11 = scmp.ne.s32.totalorder %s20_s12, %s593_s20  ;;  %p599_p13 = scmp.lt.s32.totalorder %s593_s20, %s593_s20 }
  0x1d   :  { %p600_p0 = por %p599_p13, %p598_p12 }
  0x1f   :  { %p601_p1 = pnand %p600_p0, %p594_p11 }
  0x21   :  { %604 = shalt.err (!%p601_p1)
}
  0x22   :  { %s659_s2 = smov 128   ;;  %s660_s21 = smov 8  }
  0x23   :  { %25 = dma.hbm_to_vmem [thread:$0]  %s811_s0, 256, %s20_s12, [#allocation3], %s659_s2, %s659_s2, %s660_s21  }
  0x24   :  { %s661_s24 = smov [#allocation7]   ;;  %s605_s28 = scalar_lea.hbm %s815_s4, 256 }
  0x25   :  { %s47_s25 = sshll.u32 %s661_s24, 4  ;;  %p606_p2 = scmp.ne.s32.totalorder %s815_s4, %s605_s28  ;;  %s48_s25 = int_to_ptr.vmem [resolvable:$true] %s47_s25 }
  0x26   :  { %p609_p3 = scmp.lt.u32.totalorder %s605_s28, %s815_s4 }
  0x28   :  { %p611_p4 = pnand %p609_p3, %p606_p2 }
  0x2a   :  { %614 = shalt.err (!%p611_p4)
}
  0x2b   :  { %s615_s11 = scalar_lea.vmem %s48_s25, 256  ;;  %p620_p6 = scmp.lt.s32.totalorder %s48_s25, %s48_s25 }
  0x2c   :  { %p616_p5 = scmp.ne.s32.totalorder %s48_s25, %s615_s11  ;;  %p621_p7 = scmp.lt.s32.totalorder %s615_s11, %s615_s11 }
  0x2e   :  { %p622_p8 = por %p621_p7, %p620_p6 }
  0x30   :  { %p623_p9 = pnand %p622_p8, %p616_p5 }
  0x32   :  { %626 = shalt.err (!%p623_p9)
}
  0x33   :  { %53 = dma.hbm_to_vmem [thread:$0]  %s815_s4, 256, %s48_s25, [#allocation6], %s656_s7, %s656_s7, %s657_s8  }
  0x34   :  { %649 = dma.done.wait [#allocation3], 256  }
  0x35   :  { %650 = vsyncadd [#allocation3], 4294967040 }
  0x36   :  { %651 = dma.done.wait [#allocation6], 512  }
  0x37   :  { %652 = vsyncadd [#allocation6], 4294966784  ;;  %v662_v0 = vmov 0.0   ;;  %vm663_vm0 = vmmov 0   ;;  %v549_v1 = vld [vmem:[#allocation5] sm:$0xff]   ;;  %v550_v2 = vld [vmem:[#allocation5 + $0x8] sm:$0xff]   ;;  %v139_v19 = vlaneseq }
  0x38   :  { %498 = vmatprep.subr.bf16.mxu0 %v662_v0  ;;  %502 = vmatprep.mubr.msk.bf16.mxu0 %vm663_vm0, %v662_v0  ;;  %v66_v3 = vld [vmem:[#allocation2] sm:$0xff]  ;;  %v67_v4 = vld [vmem:[#allocation2 + $0x8] sm:$0xff]  ;;  %vm92_vm1 = vcmask 261120   ;;  %s664_s13 = smov 96   ;;  %vm260_vm3 = vcmask 64512   ;;  %vm290_vm4 = vcmask 1043456  }
  0x39   :  { %506 = vmatprep.subr.bf16.mxu1 %v662_v0  ;;  %508 = vmatprep.mubr.msk.bf16.mxu1 %vm663_vm0, %v662_v0  ;;  %v68_v5 = vpack.c.bf16 %v67_v4, %v66_v3  ;;  %v470_v6 = vld [vmem:[%s814_s3] ss:$0 sm:$0xff]  ;;  %v140_v20 = vshrl.u32 %v139_v19, 7  ;;  %v142_v21 = vand.u32 127, %v139_v19  ;;  %v475_v27 = vld [vmem:[%s812_s1 + $0x1] ss:$0 sm:$0xff] }
  0x3a   :  { %499 = vmatpush3.bf16.msra.mxu0 %v549_v1  ;;  %v474_v22 = vld [vmem:[%s812_s1] ss:$0 sm:$0xff]  ;;  %v552_v61 = vld [vmem:[#allocation7 + $0x8] sm:$0xff]   ;;  %s665_s17 = smov [#allocation8]  }
  0x3b   :  { %500 = vmatprep.subr.bf16.mxu0 %v662_v0  ;;  %vm143_vm2 = vcmp.le.s32.totalorder %v142_v21, %v140_v20  ;;  %v551_v60 = vld [vmem:[#allocation7] sm:$0xff]   ;;  %s457_s18 = sshll.u32 %s665_s17, 4  ;;  %s458_s18 = int_to_ptr.vmem [resolvable:$true] %s457_s18 }
  0x3c   :  { %s627_s19 = scalar_lea.vmem %s458_s18, 256  ;;  %p632_p11 = scmp.lt.s32.totalorder %s458_s18, %s458_s18 }
  0x3d   :  { %p628_p10 = scmp.ne.s32.totalorder %s458_s18, %s627_s19  ;;  %p633_p12 = scmp.lt.s32.totalorder %s627_s19, %s627_s19 }
  0x3e   :  { %501 = vmatpush3.bf16.msra.mxu0 %v550_v2 }
  0x3f   :  { %512 = vmatprep.subr.bf16.mxu0 %v662_v0  ;;  %p634_p13 = por %p633_p12, %p632_p11 }
  0x41   :  { %503 = vmatmul.mubr.msk.bf16.vlgmr.msra.gmra.mrb[0].mxu0 %vm92_vm1, %v68_v5  ;;  %p635_p0 = pnand %p634_p13, %p628_p10 }
  0x42   :  { %514 = vmatprep.mubr.msk.bf16.mxu0 %vm663_vm0, %v662_v0 }
 0x114   :  { %v130_v7 = vpop.f32.mrb[0].mxu0 }
 0x115   :  { %v131_v8 = vadd.f32 %v470_v6, %v130_v7  ;;  %v504_v9 = vpop.f32.mrb[1].mxu0 }
 0x116   :  { %v133_v10 = vpop.f32.mrb[2].mxu0 }
 0x117   :  { %v137_v11 = vpack.c.bf16 %v131_v8, %v131_v8  ;;  %v134_v12 = vadd.f32 %v470_v6, %v133_v10  ;;  %v505_v13 = vpop.f32.mrb[3].mxu0  ;;  %v480_v8 = vld [vmem:[%s816_s5] ss:$0 sm:$0xff] }
 0x119   :  { %159 = vrot.lane.b32.xlu0 %v137_v11, %s664_s13  ;;  %v138_v14 = vpack.c.bf16 %v134_v12, %v134_v12 }
 0x11d   :  { %208 = vrot.lane.b32.xlu0 %v138_v14, %s664_s13 }
 0x18b   :  { %v160_v15 = vpop.permute.xlu0 %159 }
 0x18c   :  { %v165_v16 = vsel %vm92_vm1, %v160_v15, 0 }
 0x18d   :  { %507 = vmatpush3.bf16.xpose.msra.mxu1 %v165_v16 }
 0x18e   :  { %518 = vmatprep.subr.bf16.mxu1 %v662_v0 }
 0x18f   :  { %v209_v17 = vpop.permute.xlu0 %208 }
 0x190   :  { %v214_v18 = vsel %vm92_vm1, %v209_v17, 0 }
 0x191   :  { %513 = vmatpush3.bf16.xpose.msra.mxu0 %v214_v18 }
 0x192   :  { %524 = vmatprep.subr.bf16.mxu0 %v662_v0 }
 0x194   :  { %509 = vmatmul.mubr.msk.bf16.vlgmr.msra.gmra.mrb[0].mxu1 %vm92_vm1, %v137_v11 }
 0x195   :  { %520 = vmatprep.mubr.msk.bf16.mxu1 %vm663_vm0, %v662_v0 }
 0x198   :  { %515 = vmatmul.mubr.msk.bf16.vlgmr.msra.gmra.mrb[4].mxu0 %vm92_vm1, %v138_v14 }
 0x199   :  { %526 = vmatprep.mubr.msk.bf16.mxu0 %vm663_vm0, %v662_v0 }
 0x267   :  { %v201_v23 = vpop.f32.mrb[0].mxu1 }
 0x268   :  { %v202_v24 = vadd.f32 %v474_v22, %v201_v23  ;;  %v510_v25 = vpop.f32.mrb[1].mxu1 }
 0x269   :  { %v204_v26 = vpop.f32.mrb[2].mxu1 }
 0x26a   :  { %v511_v28 = vpop.f32.mrb[3].mxu1  ;;  %v258_v29 = vsel %vm143_vm2, %v202_v24, -10000.0 }
 0x26b   :  { %v250_v30 = vpop.f32.mrb[4].mxu0  ;;  %v261_v31 = vsel %vm260_vm3, %v258_v29, -inf }
 0x26c   :  { %v251_v32 = vadd.f32 %v475_v27, %v250_v30  ;;  %262 = vmax.xlane.f32.xlu1 %v261_v31  ;;  %v516_v33 = vpop.f32.mrb[5].mxu0 }
 0x26d   :  { %v253_v34 = vpop.f32.mrb[6].mxu0 }
 0x26e   :  { %v517_v35 = vpop.f32.mrb[7].mxu0  ;;  %v259_v36 = vsel %vm143_vm2, %v251_v32, -10000.0 }
 0x26f   :  { %v264_v37 = vsel %vm260_vm3, %v259_v36, -inf }
 0x270   :  { %265 = vmax.xlane.f32.xlu1 %v264_v37 }
 0x281   :  { %285 = vrot.lane.b32.xlu1 %v137_v11, %s656_s7 }
 0x2f9   :  { %v263_v38 = vpop.xlane.xlu1 %262 }
 0x2fa   :  { %v267_v39 = vsub.f32 %v258_v29, %v263_v38 }
 0x2fc   :  { %v269_v40 = vmul.f32 1.442695, %v267_v39 }
 0x2fd   :  { %v266_v41 = vpop.xlane.xlu1 %265 }
 0x2fe   :  { %553 = vpow2.f32 %v269_v40  ;;  %v268_v42 = vsub.f32 %v259_v36, %v266_v41 }
 0x300   :  { %v271_v43 = vmul.f32 1.442695, %v268_v42 }
 0x301   :  { %v286_v44 = vpop.permute.xlu1 %285 }
 0x302   :  { %555 = vpow2.f32 %v271_v43  ;;  %v292_v45 = vsel %vm290_vm4, %v286_v44, 0 }
 0x303   :  { %519 = vmatpush3.bf16.msra.mxu1 %v292_v45 }
 0x304   :  { %530 = vmatprep.subr.bf16.mxu1 %v662_v0 }
 0x308   :  { %v554_v46 = vpop.eup %553 }
 0x309   :  { %v273_v47 = vsel %vm260_vm3, %v554_v46, 0.0 }
 0x30a   :  { %274 = vadd.xlane.f32.xlu0 %v273_v47 }
 0x30c   :  { %v556_v48 = vpop.eup %555 }
 0x30d   :  { %v276_v49 = vsel %vm260_vm3, %v556_v48, 0.0 }
 0x30e   :  { %277 = vadd.xlane.f32.xlu1 %v276_v49 }
 0x31f   :  { %334 = vrot.lane.b32.xlu1 %v138_v14, %s656_s7 }
 0x397   :  { %v275_v50 = vpop.xlane.xlu0 %274 }
 0x398   :  { %557 = vrcp.f32 %v275_v50 }
 0x39b   :  { %v278_v51 = vpop.xlane.xlu1 %277 }
 0x39c   :  { %559 = vrcp.f32 %v278_v51 }
 0x39f   :  { %v335_v52 = vpop.permute.xlu1 %334 }
 0x3a0   :  { %v340_v53 = vsel %vm290_vm4, %v335_v52, 0 }
 0x3a1   :  { %525 = vmatpush3.bf16.msra.mxu0 %v340_v53 }
 0x3a2   :  { %v558_v54 = vpop.eup %557 }
 0x3a3   :  { %v281_v55 = vmul.f32 %v558_v54, %v554_v46 }
 0x3a5   :  { %v283_v56 = vpack.c.bf16 %v281_v55, %v281_v55 }
 0x3a6   :  { %v560_v57 = vpop.eup %559 }
 0x3a7   :  { %v282_v58 = vmul.f32 %v560_v57, %v556_v48  ;;  %521 = vmatmul.mubr.msk.bf16.vlgmr.msra.gmra.mrb[4].mxu1 %vm260_vm3, %v283_v56 }
 0x3a8   :  { %534 = vmatprep.mubr.msk.bf16.mxu1 %vm663_vm0, %v662_v0  ;;  %531 = vmatpush3.bf16.msra.mxu1 %v551_v60 }
 0x3a9   :  { %v284_v59 = vpack.c.bf16 %v282_v58, %v282_v58  ;;  %532 = vmatprep.subr.bf16.mxu1 %v662_v0 }
 0x3ab   :  { %527 = vmatmul.mubr.msk.bf16.vlgmr.msra.gmra.mrb[8].mxu0 %vm260_vm3, %v284_v59 }
 0x3ac   :  { %533 = vmatpush3.bf16.msra.mxu1 %v552_v61 }
 0x47a   :  { %v328_v62 = vpop.f32.mrb[4].mxu1 }
 0x47b   :  { %v522_v63 = vpop.f32.mrb[5].mxu1 }
 0x47c   :  { %v331_v1 = vpop.f32.mrb[6].mxu1 }
 0x47d   :  { %v523_v2 = vpop.f32.mrb[7].mxu1 }
 0x47e   :  { %v376_v3 = vpop.f32.mrb[8].mxu0 }
 0x47f   :  { %v382_v4 = vpack.c.bf16 %v376_v3, %v328_v62  ;;  %v528_v5 = vpop.f32.mrb[9].mxu0 }
 0x480   :  { %v379_v6 = vpop.f32.mrb[10].mxu0 }
 0x481   :  { %v529_v7 = vpop.f32.mrb[11].mxu0  ;;  %535 = vmatmul.mubr.msk.bf16.vlgmr.msra.gmra.mrb[8].mxu1 %vm92_vm1, %v382_v4 }
 0x554   :  { %v443_v9 = vpop.f32.mrb[8].mxu1 }
 0x555   :  { %v444_v0 = vadd.f32 %v480_v8, %v443_v9  ;;  %v536_v10 = vpop.f32.mrb[9].mxu1 }
 0x556   :  { %v446_v11 = vpop.f32.mrb[10].mxu1 }
 0x557   :  { %450 = vst.msk [vmem:[#allocation8] sm:$0xff] %vm92_vm1, %v444_v0  ;;  %v447_v12 = vadd.f32 %v480_v8, %v446_v11  ;;  %v537_v13 = vpop.f32.mrb[11].mxu1 }
 0x559   :  { %451 = vst.msk [vmem:[#allocation8 + $0x8] sm:$0xff] %vm92_vm1, %v447_v12 }
 0x55a   :  { %638 = shalt.err (!%p635_p0)
}
 0x55b   :  { %s639_s22 = scalar_lea.hbm %s817_s6, 256 }
 0x55c   :  { %p640_p1 = scmp.ne.s32.totalorder %s817_s6, %s639_s22  ;;  %p643_p2 = scmp.lt.u32.totalorder %s639_s22, %s817_s6 }
 0x55e   :  { %p645_p3 = pnand %p643_p2, %p640_p1 }
 0x560   :  { %648 = shalt.err (!%p645_p3)
}
 0x561   :  { %463 = dma.vmem_to_hbm [thread:$0]  %s458_s18, 256, %s817_s6, [#allocation4], %s659_s2, %s659_s2, %s660_s21  }
 0x562   :  { %653 = dma.done.wait [#allocation4], 256  }
 0x563   :  { %654 = vsyncadd [#allocation4], 4294967040 }
 0x564   :  { %467 = vsyncpa [#allocation3], 1 }
 0x565   :  { %468 = vsyncpa [#allocation6], 1 }
 0x566   :  { %469 = vsyncpa [#allocation4], 1 }

</bundles_post_ra>
